<compile_context>
chip_gen: v7x
topology: tpu7x:2x2x1
jax: 0.10.0
libtpu: 0.0.40
codegen_flags: <defaults>
</compile_context>

<pallas_src>
import functools
import math

import jax
import jax.numpy as jnp
from jax.experimental import pallas as pl
from jax.experimental.pallas import tpu as pltpu

LANE = 128        # lane width: pad internal matmul dims to multiples of this
SUBLANE = 8
TRUNK_DIMS = (128, 256, 128, 32)   # trunk layer widths from the PyTorch module


def _round_up(n, m):
    return ((n + m - 1) // m) * m


def _cdiv(a, b):
    return (a + b - 1) // b


# ---------------------------------------------------------------------------
# Kernel: one batch tile through the whole network.
#   trunk: 4 x (bf16 matmul on MXU w/ f32 accum + f32 bias + SiLU in f32)
#   heads: single fused lane-dense matmul (all heads concatenated, zero-padded),
#          result stored as bf16.
# ---------------------------------------------------------------------------
def _kernel(x_ref, w0, b0, w1, b1, w2, b2, w3, b3, wh, bh, out_ref):
    h = x_ref[...].astype(jnp.bfloat16)                      # no-op if x already bf16
    for w_ref, b_ref in ((w0, b0), (w1, b1), (w2, b2), (w3, b3)):
        y = jnp.dot(h, w_ref[...],
                    preferred_element_type=jnp.float32) + b_ref[...]
        y = y * jax.nn.sigmoid(y)                            # SiLU in f32 (VPU/EUP)
        h = y.astype(jnp.bfloat16)
    out_ref[...] = (jnp.dot(h, wh[...], preferred_element_type=jnp.float32)
                    + bh[...]).astype(out_ref.dtype)


# ---------------------------------------------------------------------------
# Parameter init (logical, f32, same scale as PyTorch default) and packing
# (lane-padding + bf16 weight cast + head fusion) done once, outside the jit.
# ---------------------------------------------------------------------------
def init_params(key, input_dim, output_dims):
    params = {"trunk": [], "heads": []}
    dims = (input_dim,) + TRUNK_DIMS
    for i in range(4):
        fan_in, fan_out = dims[i], dims[i + 1]
        key, kw, kb = jax.random.split(key, 3)
        bound = 1.0 / math.sqrt(fan_in)
        w = jax.random.uniform(kw, (fan_in, fan_out), jnp.float32, -bound, bound)
        b = jax.random.uniform(kb, (fan_out,), jnp.float32, -bound, bound)
        params["trunk"].append((w, b))
    for dim in output_dims:
        fan_in = TRUNK_DIMS[-1]
        key, kw, kb = jax.random.split(key, 3)
        bound = 1.0 / math.sqrt(fan_in)
        w = jax.random.uniform(kw, (fan_in, dim), jnp.float32, -bound, bound)
        b = jax.random.uniform(kb, (dim,), jnp.float32, -bound, bound)
        params["heads"].append((w, b))
    return params


def pack_params(params, input_dim, output_dims):
    """Lane-pad internal dims, cast weights to bf16, fuse all heads.

    The input fan-in is kept at its TRUE size (no column padding of x needed);
    a block last-dim equal to the full array dim is always legal in Pallas.
    Padded columns get zero weights/biases so silu(0)=0 propagates exact zeros.
    """
    dims = (input_dim,) + TRUNK_DIMS
    pdims = (input_dim,) + tuple(_round_up(d, LANE) for d in TRUNK_DIMS)

    packed = {"trunk": []}
    for i, (w, b) in enumerate(params["trunk"]):
        fi, fo = dims[i], dims[i + 1]
        fip, fop = pdims[i], pdims[i + 1]
        w_p = jnp.zeros((fip, fop), jnp.float32).at[:fi, :fo].set(w)
        b_p = jnp.zeros((1, fop), jnp.float32).at[0, :fo].set(b)
        packed["trunk"].append((w_p.astype(jnp.bfloat16), b_p))

    # Fuse all output heads into one lane-dense matmul.
    h_in, h_in_pad = dims[-1], pdims[-1]
    total = sum(output_dims)
    total_pad = _round_up(total, LANE)
    wh = jnp.zeros((h_in_pad, total_pad), jnp.float32)
    bh = jnp.zeros((1, total_pad), jnp.float32)
    off = 0
    for (w, b), d in zip(params["heads"], output_dims):
        wh = wh.at[:h_in, off:off + d].set(w)
        bh = bh.at[0, off:off + d].set(b)
        off += d
    packed["head_w"] = wh.astype(jnp.bfloat16)
    packed["head_b"] = bh
    return packed


# ---------------------------------------------------------------------------
# Forward wrapper: batch-gridded pallas_call, weights resident via constant maps.
# ---------------------------------------------------------------------------
@functools.partial(jax.jit, static_argnames=("output_dims", "tile_b"))
def nn_model_forward(x, packed, output_dims, tile_b=1024):
    B, D = x.shape
    out_pad = packed["head_b"].shape[1]

    # --- adaptive batch tiling (no overshoot, >=2 grid steps when possible for v7x) ---
    B8 = _round_up(B, SUBLANE)
    min_grid = 2 if B8 >= 2 * SUBLANE else 1       # let both v7x TCs get work
    grid_n = max(min_grid, _cdiv(B8, tile_b))
    tb = _round_up(_cdiv(B8, grid_n), SUBLANE)     # padding waste < 8 rows per step
    grid_n = _cdiv(B8, tb)
    B_pad = grid_n * tb

    if B_pad == B:
        # No padding needed: feed x directly (single f32 HBM read inside the kernel,
        # which is less total traffic than an extra bf16 pre-cast pass).
        x_in = x
    else:
        # Single fused op: cast to bf16 + zero row-pad (padded copy written at half width).
        x_in = jnp.pad(x.astype(jnp.bfloat16), ((0, B_pad - B), (0, 0)))

    flat = [x_in]
    for w, b in packed["trunk"]:
        flat += [w, b]
    flat += [packed["head_w"], packed["head_b"]]

    def const_spec(a):  # weights/biases: full array, same block every grid step (resident)
        return pl.BlockSpec(a.shape, lambda i: (0, 0))

    in_specs = [pl.BlockSpec((tb, D), lambda i: (i, 0))]
    in_specs += [const_spec(a) for a in flat[1:]]

    # advisory cost hint for the XLA scheduler
    mm_shapes = [w.shape for (w, _) in packed["trunk"]] + [packed["head_w"].shape]
    flops = 2 * B_pad * sum(k * n for (k, n) in mm_shapes)
    transc = B_pad * sum(n for (_, n) in mm_shapes[:-1])       # sigmoid per trunk col
    bytes_acc = (int(x_in.size) * x_in.dtype.itemsize
                 + B_pad * out_pad * 2
                 + sum(int(a.size) * a.dtype.itemsize for a in flat[1:]))

    out = pl.pallas_call(
        _kernel,
        out_shape=jax.ShapeDtypeStruct((B_pad, out_pad), jnp.bfloat16),
        grid=(grid_n,),
        in_specs=in_specs,
        out_specs=pl.BlockSpec((tb, out_pad), lambda i: (i, 0)),
        compiler_params=pltpu.CompilerParams(
            dimension_semantics=("parallel",)),
        cost_estimate=pl.CostEstimate(
            flops=flops, transcendentals=transc, bytes_accessed=bytes_acc),
    )(*flat)

    # split the fused lane-dense bf16 output slab back into per-head f32 outputs
    outs, off = [], 0
    for d in output_dims:
        outs.append(out[:B, off:off + d].astype(jnp.float32))
        off += d
    return outs


def nn_model_reference(x, params):
    """Pure-JAX f32 reference of the PyTorch forward pass (unpadded params)."""
    h = x
    for w, b in params["trunk"]:
        h = jax.nn.silu(h @ w + b)
    return [h @ w + b for (w, b) in params["heads"]]


if __name__ == "__main__":
    batch = 8
    input_dim = 64
    output_dims = (4, 10)   # two prediction heads

    params = init_params(jax.random.PRNGKey(42), input_dim, output_dims)
    packed = pack_params(params, input_dim, output_dims)
    x = jax.random.normal(jax.random.PRNGKey(0), (batch, input_dim), jnp.float32)

    outs = nn_model_forward(x, packed, output_dims)
    outs = [jax.block_until_ready(o) for o in outs]

    refs = nn_model_reference(x, params)
    for o, r, d in zip(outs, refs, output_dims):
        assert o.shape == (batch, d), (o.shape, (batch, d))
        # bf16 MXU matmuls + bf16 output store -> relaxed tolerance vs f32 reference
        err = float(jnp.max(jnp.abs(o - r)))
        assert jnp.allclose(o, r, atol=5e-2, rtol=5e-2), f"mismatch, max|diff|={err}"

    print("KERNEL_OK")
</pallas_src>

<mosaic_0001>
module attributes {stable_mosaic.version = 11 : i64} {
  func.func @_kernel(%arg0: i32, %arg1: memref<8x64xf32, #tpu.memory_space<vmem>>, %arg2: memref<64x128xbf16, #tpu.memory_space<vmem>>, %arg3: memref<1x128xf32, #tpu.memory_space<vmem>>, %arg4: memref<128x256xbf16, #tpu.memory_space<vmem>>, %arg5: memref<1x256xf32, #tpu.memory_space<vmem>>, %arg6: memref<256x128xbf16, #tpu.memory_space<vmem>>, %arg7: memref<1x128xf32, #tpu.memory_space<vmem>>, %arg8: memref<128x128xbf16, #tpu.memory_space<vmem>>, %arg9: memref<1x128xf32, #tpu.memory_space<vmem>>, %arg10: memref<128x128xbf16, #tpu.memory_space<vmem>>, %arg11: memref<1x128xf32, #tpu.memory_space<vmem>>, %arg12: memref<8x128xbf16, #tpu.memory_space<vmem>>) attributes {dimension_semantics = [#tpu.dimension_semantics<parallel>], iteration_bounds = array<i64: 1>, scalar_prefetch = 0 : i64, scratch_operands = 0 : i64, tpu.core_type = #tpu.core_type<tc>, window_params = [{transform_indices = @transform_0, window_bounds = array<i64: 8, 64>}, {pipeline_mode = #tpu.pipeline_mode<synchronous>, transform_indices = @transform_1, window_bounds = array<i64: 64, 128>}, {pipeline_mode = #tpu.pipeline_mode<synchronous>, transform_indices = @transform_2, window_bounds = array<i64: 1, 128>}, {pipeline_mode = #tpu.pipeline_mode<synchronous>, transform_indices = @transform_3, window_bounds = array<i64: 128, 256>}, {pipeline_mode = #tpu.pipeline_mode<synchronous>, transform_indices = @transform_4, window_bounds = array<i64: 1, 256>}, {pipeline_mode = #tpu.pipeline_mode<synchronous>, transform_indices = @transform_5, window_bounds = array<i64: 256, 128>}, {pipeline_mode = #tpu.pipeline_mode<synchronous>, transform_indices = @transform_6, window_bounds = array<i64: 1, 128>}, {pipeline_mode = #tpu.pipeline_mode<synchronous>, transform_indices = @transform_7, window_bounds = array<i64: 128, 128>}, {pipeline_mode = #tpu.pipeline_mode<synchronous>, transform_indices = @transform_8, window_bounds = array<i64: 1, 128>}, {pipeline_mode = #tpu.pipeline_mode<synchronous>, transform_indices = @transform_9, window_bounds = array<i64: 128, 128>}, {pipeline_mode = #tpu.pipeline_mode<synchronous>, transform_indices = @transform_10, window_bounds = array<i64: 1, 128>}, {transform_indices = @transform_11, window_bounds = array<i64: 8, 128>}]} {
    %c0 = arith.constant 0 : index
    %c0_0 = arith.constant 0 : index
    %0 = vector.load %arg1[%c0, %c0_0] : memref<8x64xf32, #tpu.memory_space<vmem>>, vector<8x64xf32>
    %1 = arith.truncf %0 : vector<8x64xf32> to vector<8x64xbf16>
    %c0_1 = arith.constant 0 : index
    %c0_2 = arith.constant 0 : index
    %2 = vector.load %arg2[%c0_1, %c0_2] : memref<64x128xbf16, #tpu.memory_space<vmem>>, vector<64x128xbf16>
    %cst = arith.constant dense<0.000000e+00> : vector<8x128xf32>
    %3 = tpu.matmul %1, %2, %cst {dimension_numbers = #tpu.dot_dimension_numbers<[1], [0], [0], [1], [0, 0, 1, 1], [], []>} : vector<8x64xbf16>, vector<64x128xbf16>, vector<8x128xf32> -> vector<8x128xf32>
    %c0_3 = arith.constant 0 : index
    %c0_4 = arith.constant 0 : index
    %4 = vector.load %arg3[%c0_3, %c0_4] : memref<1x128xf32, #tpu.memory_space<vmem>>, vector<1x128xf32>
    %5 = vector.broadcast %4 : vector<1x128xf32> to vector<8x128xf32>
    %6 = arith.addf %3, %5 : vector<8x128xf32>
    %7 = arith.negf %6 : vector<8x128xf32>
    %8 = math.exp %7 : vector<8x128xf32>
    %cst_5 = arith.constant 1.000000e+00 : f32
    %9 = vector.broadcast %cst_5 : f32 to vector<8x128xf32>
    %10 = arith.addf %9, %8 : vector<8x128xf32>
    %11 = arith.divf %9, %10 : vector<8x128xf32>
    %12 = arith.mulf %6, %11 : vector<8x128xf32>
    %13 = arith.truncf %12 : vector<8x128xf32> to vector<8x128xbf16>
    %c0_6 = arith.constant 0 : index
    %c0_7 = arith.constant 0 : index
    %14 = vector.load %arg4[%c0_6, %c0_7] : memref<128x256xbf16, #tpu.memory_space<vmem>>, vector<128x256xbf16>
    %cst_8 = arith.constant dense<0.000000e+00> : vector<8x256xf32>
    %15 = tpu.matmul %13, %14, %cst_8 {dimension_numbers = #tpu.dot_dimension_numbers<[1], [0], [0], [1], [0, 0, 1, 1], [], []>} : vector<8x128xbf16>, vector<128x256xbf16>, vector<8x256xf32> -> vector<8x256xf32>
    %c0_9 = arith.constant 0 : index
    %c0_10 = arith.constant 0 : index
    %16 = vector.load %arg5[%c0_9, %c0_10] : memref<1x256xf32, #tpu.memory_space<vmem>>, vector<1x256xf32>
    %17 = vector.broadcast %16 : vector<1x256xf32> to vector<8x256xf32>
    %18 = arith.addf %15, %17 : vector<8x256xf32>
    %19 = arith.negf %18 : vector<8x256xf32>
    %20 = math.exp %19 : vector<8x256xf32>
    %cst_11 = arith.constant 1.000000e+00 : f32
    %21 = vector.broadcast %cst_11 : f32 to vector<8x256xf32>
    %22 = arith.addf %21, %20 : vector<8x256xf32>
    %23 = arith.divf %21, %22 : vector<8x256xf32>
    %24 = arith.mulf %18, %23 : vector<8x256xf32>
    %25 = arith.truncf %24 : vector<8x256xf32> to vector<8x256xbf16>
    %c0_12 = arith.constant 0 : index
    %c0_13 = arith.constant 0 : index
    %26 = vector.load %arg6[%c0_12, %c0_13] : memref<256x128xbf16, #tpu.memory_space<vmem>>, vector<256x128xbf16>
    %cst_14 = arith.constant dense<0.000000e+00> : vector<8x128xf32>
    %27 = tpu.matmul %25, %26, %cst_14 {dimension_numbers = #tpu.dot_dimension_numbers<[1], [0], [0], [1], [0, 0, 1, 1], [], []>} : vector<8x256xbf16>, vector<256x128xbf16>, vector<8x128xf32> -> vector<8x128xf32>
    %c0_15 = arith.constant 0 : index
    %c0_16 = arith.constant 0 : index
    %28 = vector.load %arg7[%c0_15, %c0_16] : memref<1x128xf32, #tpu.memory_space<vmem>>, vector<1x128xf32>
    %29 = vector.broadcast %28 : vector<1x128xf32> to vector<8x128xf32>
    %30 = arith.addf %27, %29 : vector<8x128xf32>
    %31 = arith.negf %30 : vector<8x128xf32>
    %32 = math.exp %31 : vector<8x128xf32>
    %cst_17 = arith.constant 1.000000e+00 : f32
    %33 = vector.broadcast %cst_17 : f32 to vector<8x128xf32>
    %34 = arith.addf %33, %32 : vector<8x128xf32>
    %35 = arith.divf %33, %34 : vector<8x128xf32>
    %36 = arith.mulf %30, %35 : vector<8x128xf32>
    %37 = arith.truncf %36 : vector<8x128xf32> to vector<8x128xbf16>
    %c0_18 = arith.constant 0 : index
    %c0_19 = arith.constant 0 : index
    %38 = vector.load %arg8[%c0_18, %c0_19] : memref<128x128xbf16, #tpu.memory_space<vmem>>, vector<128x128xbf16>
    %cst_20 = arith.constant dense<0.000000e+00> : vector<8x128xf32>
    %39 = tpu.matmul %37, %38, %cst_20 {dimension_numbers = #tpu.dot_dimension_numbers<[1], [0], [0], [1], [0, 0, 1, 1], [], []>} : vector<8x128xbf16>, vector<128x128xbf16>, vector<8x128xf32> -> vector<8x128xf32>
    %c0_21 = arith.constant 0 : index
    %c0_22 = arith.constant 0 : index
    %40 = vector.load %arg9[%c0_21, %c0_22] : memref<1x128xf32, #tpu.memory_space<vmem>>, vector<1x128xf32>
    %41 = vector.broadcast %40 : vector<1x128xf32> to vector<8x128xf32>
    %42 = arith.addf %39, %41 : vector<8x128xf32>
    %43 = arith.negf %42 : vector<8x128xf32>
    %44 = math.exp %43 : vector<8x128xf32>
    %cst_23 = arith.constant 1.000000e+00 : f32
    %45 = vector.broadcast %cst_23 : f32 to vector<8x128xf32>
    %46 = arith.addf %45, %44 : vector<8x128xf32>
    %47 = arith.divf %45, %46 : vector<8x128xf32>
    %48 = arith.mulf %42, %47 : vector<8x128xf32>
    %49 = arith.truncf %48 : vector<8x128xf32> to vector<8x128xbf16>
    %c0_24 = arith.constant 0 : index
    %c0_25 = arith.constant 0 : index
    %50 = vector.load %arg10[%c0_24, %c0_25] : memref<128x128xbf16, #tpu.memory_space<vmem>>, vector<128x128xbf16>
    %cst_26 = arith.constant dense<0.000000e+00> : vector<8x128xf32>
    %51 = tpu.matmul %49, %50, %cst_26 {dimension_numbers = #tpu.dot_dimension_numbers<[1], [0], [0], [1], [0, 0, 1, 1], [], []>} : vector<8x128xbf16>, vector<128x128xbf16>, vector<8x128xf32> -> vector<8x128xf32>
    %c0_27 = arith.constant 0 : index
    %c0_28 = arith.constant 0 : index
    %52 = vector.load %arg11[%c0_27, %c0_28] : memref<1x128xf32, #tpu.memory_space<vmem>>, vector<1x128xf32>
    %53 = vector.broadcast %52 : vector<1x128xf32> to vector<8x128xf32>
    %54 = arith.addf %51, %53 : vector<8x128xf32>
    %55 = arith.truncf %54 : vector<8x128xf32> to vector<8x128xbf16>
    %c0_29 = arith.constant 0 : index
    %c0_30 = arith.constant 0 : index
    %56 = vector.load %arg12[%c0_29, %c0_30] : memref<8x128xbf16, #tpu.memory_space<vmem>>, vector<8x128xbf16>
    tpu.vector_store %arg12[%c0_29, %c0_30], %55 {strides = array<i32>} : memref<8x128xbf16, #tpu.memory_space<vmem>>, vector<8x128xbf16>,
    return
  }
  func.func @transform_0(%arg0: i32) -> (i32, i32) {
    %c0_i32 = arith.constant 0 : i32
    %c0_i32_0 = arith.constant 0 : i32
    return %arg0, %c0_i32 : i32, i32
  }
  func.func @transform_1(%arg0: i32) -> (i32, i32) {
    %c0_i32 = arith.constant 0 : i32
    %c0_i32_0 = arith.constant 0 : i32
    %c0_i32_1 = arith.constant 0 : i32
    return %c0_i32, %c0_i32_0 : i32, i32
  }
  func.func @transform_2(%arg0: i32) -> (i32, i32) {
    %c0_i32 = arith.constant 0 : i32
    %c0_i32_0 = arith.constant 0 : i32
    %c0_i32_1 = arith.constant 0 : i32
    return %c0_i32, %c0_i32_0 : i32, i32
  }
  func.func @transform_3(%arg0: i32) -> (i32, i32) {
    %c0_i32 = arith.constant 0 : i32
    %c0_i32_0 = arith.constant 0 : i32
    %c0_i32_1 = arith.constant 0 : i32
    return %c0_i32, %c0_i32_0 : i32, i32
  }
  func.func @transform_4(%arg0: i32) -> (i32, i32) {
    %c0_i32 = arith.constant 0 : i32
    %c0_i32_0 = arith.constant 0 : i32
    %c0_i32_1 = arith.constant 0 : i32
    return %c0_i32, %c0_i32_0 : i32, i32
  }
  func.func @transform_5(%arg0: i32) -> (i32, i32) {
    %c0_i32 = arith.constant 0 : i32
    %c0_i32_0 = arith.constant 0 : i32
    %c0_i32_1 = arith.constant 0 : i32
    return %c0_i32, %c0_i32_0 : i32, i32
  }
  func.func @transform_6(%arg0: i32) -> (i32, i32) {
    %c0_i32 = arith.constant 0 : i32
    %c0_i32_0 = arith.constant 0 : i32
    %c0_i32_1 = arith.constant 0 : i32
    return %c0_i32, %c0_i32_0 : i32, i32
  }
  func.func @transform_7(%arg0: i32) -> (i32, i32) {
    %c0_i32 = arith.constant 0 : i32
    %c0_i32_0 = arith.constant 0 : i32
    %c0_i32_1 = arith.constant 0 : i32
    return %c0_i32, %c0_i32_0 : i32, i32
  }
  func.func @transform_8(%arg0: i32) -> (i32, i32) {
    %c0_i32 = arith.constant 0 : i32
    %c0_i32_0 = arith.constant 0 : i32
    %c0_i32_1 = arith.constant 0 : i32
    return %c0_i32, %c0_i32_0 : i32, i32
  }
  func.func @transform_9(%arg0: i32) -> (i32, i32) {
    %c0_i32 = arith.constant 0 : i32
    %c0_i32_0 = arith.constant 0 : i32
    %c0_i32_1 = arith.constant 0 : i32
    return %c0_i32, %c0_i32_0 : i32, i32
  }
  func.func @transform_10(%arg0: i32) -> (i32, i32) {
    %c0_i32 = arith.constant 0 : i32
    %c0_i32_0 = arith.constant 0 : i32
    %c0_i32_1 = arith.constant 0 : i32
    return %c0_i32, %c0_i32_0 : i32, i32
  }
  func.func @transform_11(%arg0: i32) -> (i32, i32) {
    %c0_i32 = arith.constant 0 : i32
    %c0_i32_0 = arith.constant 0 : i32
    return %arg0, %c0_i32 : i32, i32
  }
}

</mosaic_0001>

<bundles_post_ra>
// kernel: nn_model_forward.1
= control target key start
LH: loop header
LB: loop body
LE: loop exit
PB: predicated region body
PF: predicated region fallthrough
CT: control target
= control target key end

     0   :  { %16 = vsyncpa [#allocation3], 0  ;;  %s1437_s0 = inlined_call_operand.hbm [shape: f32[8,64], index: 0, kind: input, shape index: {}]   ;;  %s1438_s1 = inlined_call_operand.hbm [shape: bf16[64,128], index: 1, kind: input, shape index: {}]   ;;  %s1439_s2 = inlined_call_operand.vmem [shape: f32[1,128], index: 2, kind: input, shape index: {}]   ;;  %s1440_s3 = inlined_call_operand.hbm [shape: bf16[128,256], index: 3, kind: input, shape index: {}]   ;;  %s1441_s4 = inlined_call_operand.vmem [shape: f32[1,256], index: 4, kind: input, shape index: {}]   ;;  %s1442_s5 = inlined_call_operand.hbm [shape: bf16[256,128], index: 5, kind: input, shape index: {}]   ;;  %s1443_s6 = inlined_call_operand.vmem [shape: f32[1,128], index: 6, kind: input, shape index: {}]   ;;  %s1444_s7 = inlined_call_operand.hbm [shape: bf16[128,128], index: 7, kind: input, shape index: {}]   ;;  %s1445_s8 = inlined_call_operand.hbm [shape: f32[1,128], index: 8, kind: input, shape index: {}]   ;;  %s1446_s9 = inlined_call_operand.hbm [shape: bf16[128,128], index: 9, kind: input, shape index: {}]   ;;  %s1447_s10 = inlined_call_operand.vmem [shape: f32[1,128], index: 10, kind: input, shape index: {}]   ;;  %s1448_s11 = inlined_call_operand.vmem [shape: bf16[8,128], index: 11, kind: output, shape index: {}]  }
   0x1   :  { %17 = vsyncpa [#allocation5], 0 }
   0x2   :  { %18 = vsyncpa [#allocation8], 0 }
   0x3   :  { %19 = vsyncpa [#allocation11], 0  ;;  %s1226_s17 = smov [#allocation4]   ;;  %s1064_s21 = scalar_lea.hbm %s1438_s1, 512 }
   0x4   :  { %s35_s18 = sshll.u32 %s1226_s17, 4  ;;  %p1065_p0 = scmp.ne.s32.totalorder %s1438_s1, %s1064_s21  ;;  %s36_s18 = int_to_ptr.vmem [resolvable:$true] %s35_s18 }
   0x5   :  { %p1068_p1 = scmp.lt.u32.totalorder %s1064_s21, %s1438_s1 }
   0x7   :  { %p1070_p2 = pnand %p1068_p1, %p1065_p0 }
   0x9   :  { %1073 = shalt.err (!%p1070_p2)
}
   0xa   :  { %s1074_s26 = scalar_lea.vmem %s36_s18, 512  ;;  %p1079_p4 = scmp.lt.s32.totalorder %s36_s18, %s36_s18 }
   0xb   :  { %p1075_p3 = scmp.ne.s32.totalorder %s36_s18, %s1074_s26  ;;  %p1080_p5 = scmp.lt.s32.totalorder %s1074_s26, %s1074_s26 }
   0xd   :  { %p1081_p6 = por %p1080_p5, %p1079_p4 }
   0xf   :  { %p1082_p7 = pnand %p1081_p6, %p1075_p3 }
  0x11   :  { %1085 = shalt.err (!%p1082_p7)
}
  0x12   :  { %s1227_s27 = smov 64   ;;  %s1228_s28 = smov 4  }
  0x13   :  { %41 = dma.hbm_to_vmem [thread:$0]  %s1438_s1, 512, %s36_s18, [#allocation5], %s1227_s27, %s1227_s27, %s1228_s28  }
  0x14   :  { %s1229_s12 = smov [#allocation7]   ;;  %s1230_s14 = smov [#allocation10]  }
  0x15   :  { %s63_s13 = sshll.u32 %s1229_s12, 4  ;;  %s90_s15 = sshll.u32 %s1230_s14, 4  ;;  %s64_s13 = int_to_ptr.vmem [resolvable:$true] %s63_s13  ;;  %s91_s15 = int_to_ptr.vmem [resolvable:$true] %s90_s15 }
  0x16   :  { %s1086_s19 = scalar_lea.hbm %s1442_s5, 2048 }
  0x17   :  { %p1087_p8 = scmp.ne.s32.totalorder %s1442_s5, %s1086_s19  ;;  %p1090_p9 = scmp.lt.u32.totalorder %s1086_s19, %s1442_s5 }
  0x19   :  { %p1092_p10 = pnand %p1090_p9, %p1087_p8 }
  0x1b   :  { %1095 = shalt.err (!%p1092_p10)
}
  0x1c   :  { %s1096_s1 = scalar_lea.vmem %s64_s13, 2048  ;;  %p1101_p12 = scmp.lt.s32.totalorder %s64_s13, %s64_s13 }
  0x1d   :  { %p1097_p11 = scmp.ne.s32.totalorder %s64_s13, %s1096_s1  ;;  %p1102_p13 = scmp.lt.s32.totalorder %s1096_s1, %s1096_s1 }
  0x1f   :  { %p1103_p0 = por %p1102_p13, %p1101_p12 }
  0x21   :  { %p1104_p1 = pnand %p1103_p0, %p1097_p11 }
  0x23   :  { %1107 = shalt.err (!%p1104_p1)
}
  0x24   :  { %69 = dma.hbm_to_vmem [thread:$0]  %s1442_s5, 2048, %s64_s13, [#allocation8], %s1227_s27, %s1227_s27, %s1228_s28  }
  0x25   :  { %s1108_s29 = scalar_lea.hbm %s1445_s8, 16 }
  0x26   :  { %p1109_p2 = scmp.ne.s32.totalorder %s1445_s8, %s1108_s29  ;;  %p1112_p3 = scmp.lt.u32.totalorder %s1108_s29, %s1445_s8 }
  0x28   :  { %p1114_p4 = pnand %p1112_p3, %p1109_p2 }
  0x2a   :  { %1117 = shalt.err (!%p1114_p4)
}
  0x2b   :  { %s1118_s17 = scalar_lea.vmem %s91_s15, 16  ;;  %s1122_s19 = scalar_lea.vmem %s91_s15, 32 }
  0x2c   :  { %p1119_p5 = scmp.ne.s32.totalorder %s91_s15, %s1118_s17  ;;  %p1123_p6 = scmp.lt.s32.totalorder %s91_s15, %s91_s15 }
  0x2d   :  { %p1124_p7 = scmp.lt.s32.totalorder %s1122_s19, %s1118_s17 }
  0x2f   :  { %p1125_p8 = por %p1124_p7, %p1123_p6 }
  0x31   :  { %p1126_p9 = pnand %p1125_p8, %p1119_p5 }
  0x33   :  { %1129 = shalt.err (!%p1126_p9)
}
  0x34   :  { %93 = dma.hbm_to_vmem [thread:$0]  %s1445_s8, 16, %s91_s15, [#allocation11]  }
  0x35   :  { %s1231_s20 = smov [#allocation2]   ;;  %s1232_s22 = smov [#allocation6]  }
  0x36   :  { %s26_s21 = sshll.u32 %s1231_s20, 4  ;;  %s49_s23 = sshll.u32 %s1232_s22, 4  ;;  %s27_s21 = int_to_ptr.vmem [resolvable:$true] %s26_s21  ;;  %s50_s23 = int_to_ptr.vmem [resolvable:$true] %s49_s23 }
  0x37   :  { %s1130_s24 = scalar_lea.hbm %s1437_s0, 128 }
  0x38   :  { %p1131_p10 = scmp.ne.s32.totalorder %s1437_s0, %s1130_s24  ;;  %p1134_p11 = scmp.lt.u32.totalorder %s1130_s24, %s1437_s0 }
  0x3a   :  { %p1136_p12 = pnand %p1134_p11, %p1131_p10 }
  0x3c   :  { %1139 = shalt.err (!%p1136_p12)
}
  0x3d   :  { %s1140_s8 = scalar_lea.vmem %s27_s21, 128  ;;  %p1145_p0 = scmp.lt.s32.totalorder %s27_s21, %s27_s21 }
  0x3e   :  { %p1141_p13 = scmp.ne.s32.totalorder %s27_s21, %s1140_s8  ;;  %p1146_p1 = scmp.lt.s32.totalorder %s1140_s8, %s1140_s8 }
  0x40   :  { %p1147_p2 = por %p1146_p1, %p1145_p0 }
  0x42   :  { %p1148_p3 = pnand %p1147_p2, %p1141_p13 }
  0x44   :  { %1151 = shalt.err (!%p1148_p3)
}
  0x45   :  { %29 = dma.hbm_to_vmem [thread:$0]  %s1437_s0, 128, %s27_s21, [#allocation3]  }
  0x46   :  { %s1152_s17 = scalar_lea.hbm %s1440_s3, 2048 }
  0x47   :  { %p1153_p4 = scmp.ne.s32.totalorder %s1440_s3, %s1152_s17  ;;  %p1156_p5 = scmp.lt.u32.totalorder %s1152_s17, %s1440_s3 }
  0x49   :  { %p1158_p6 = pnand %p1156_p5, %p1153_p4 }
  0x4b   :  { %1161 = shalt.err (!%p1158_p6)
}
  0x4c   :  { %s1162_s22 = scalar_lea.vmem %s50_s23, 2048  ;;  %p1167_p8 = scmp.lt.s32.totalorder %s50_s23, %s50_s23 }
  0x4d   :  { %p1163_p7 = scmp.ne.s32.totalorder %s50_s23, %s1162_s22  ;;  %p1168_p9 = scmp.lt.s32.totalorder %s1162_s22, %s1162_s22 }
  0x4f   :  { %p1169_p10 = por %p1168_p9, %p1167_p8 }
  0x51   :  { %p1170_p11 = pnand %p1169_p10, %p1163_p7 }
  0x53   :  { %1173 = shalt.err (!%p1170_p11)
}
  0x54   :  { %s1233_s0 = smov 128   ;;  %s1234_s21 = smov 8  }
  0x55   :  { %55 = dma.hbm_to_vmem [thread:$0]  %s1440_s3, 2048, %s50_s23, [#allocation5], %s1233_s0, %s1233_s0, %s1234_s21  }
  0x56   :  { %s1235_s24 = smov [#allocation9]   ;;  %s1236_s26 = smov [#allocation12]  }
  0x57   :  { %s77_s25 = sshll.u32 %s1235_s24, 4  ;;  %s99_s29 = sshll.u32 %s1236_s26, 4  ;;  %s78_s25 = int_to_ptr.vmem [resolvable:$true] %s77_s25  ;;  %s100_s29 = int_to_ptr.vmem [resolvable:$true] %s99_s29 }
  0x58   :  { %s1174_s15 = scalar_lea.hbm %s1444_s7, 1024 }
  0x59   :  { %p1175_p12 = scmp.ne.s32.totalorder %s1444_s7, %s1174_s15  ;;  %p1178_p13 = scmp.lt.u32.totalorder %s1174_s15, %s1444_s7 }
  0x5b   :  { %p1180_p0 = pnand %p1178_p13, %p1175_p12 }
  0x5d   :  { %1183 = shalt.err (!%p1180_p0)
}
  0x5e   :  { %s1184_s3 = scalar_lea.vmem %s78_s25, 1024  ;;  %p1189_p2 = scmp.lt.s32.totalorder %s78_s25, %s78_s25 }
  0x5f   :  { %p1185_p1 = scmp.ne.s32.totalorder %s78_s25, %s1184_s3  ;;  %p1190_p3 = scmp.lt.s32.totalorder %s1184_s3, %s1184_s3 }
  0x61   :  { %p1191_p4 = por %p1190_p3, %p1189_p2 }
  0x63   :  { %p1192_p5 = pnand %p1191_p4, %p1185_p1 }
  0x65   :  { %1195 = shalt.err (!%p1192_p5)
}
  0x66   :  { %83 = dma.hbm_to_vmem [thread:$0]  %s1444_s7, 1024, %s78_s25, [#allocation8], %s1227_s27, %s1227_s27, %s1228_s28  }
  0x67   :  { %s1196_s20 = scalar_lea.hbm %s1446_s9, 1024 }
  0x68   :  { %p1197_p6 = scmp.ne.s32.totalorder %s1446_s9, %s1196_s20  ;;  %p1200_p7 = scmp.lt.u32.totalorder %s1196_s20, %s1446_s9 }
  0x6a   :  { %p1202_p8 = pnand %p1200_p7, %p1197_p6 }
  0x6c   :  { %1205 = shalt.err (!%p1202_p8)
}
  0x6d   :  { %s1206_s18 = scalar_lea.vmem %s100_s29, 1024  ;;  %p1211_p10 = scmp.lt.s32.totalorder %s100_s29, %s100_s29 }
  0x6e   :  { %p1207_p9 = scmp.ne.s32.totalorder %s100_s29, %s1206_s18  ;;  %p1212_p11 = scmp.lt.s32.totalorder %s1206_s18, %s1206_s18 }
  0x70   :  { %p1213_p12 = por %p1212_p11, %p1211_p10 }
  0x72   :  { %p1214_p13 = pnand %p1213_p12, %p1207_p9 }
  0x74   :  { %1217 = shalt.err (!%p1214_p13)
}
  0x75   :  { %105 = dma.hbm_to_vmem [thread:$0]  %s1446_s9, 1024, %s100_s29, [#allocation11], %s1227_s27, %s1227_s27, %s1228_s28  }
  0x76   :  { %1218 = dma.done.wait [#allocation3], 128  }
  0x77   :  { %1219 = vsyncadd [#allocation3], 4294967168 }
  0x78   :  { %1220 = dma.done.wait [#allocation5], 2560  }
  0x79   :  { %1221 = vsyncadd [#allocation5], 4294964736 }
  0x7a   :  { %1222 = dma.done.wait [#allocation8], 3072  }
  0x7b   :  { %1223 = vsyncadd [#allocation8], 4294964224 }
  0x7c   :  { %1224 = dma.done.wait [#allocation11], 1040  }
  0x7d   :  { %1225 = vsyncadd [#allocation11], 4294966256  ;;  %v1237_v0 = vmov 0.0   ;;  %vm1238_vm0 = vmmov 0   ;;  %v984_v1 = vld [vmem:[#allocation4] sm:$0xff]   ;;  %v985_v2 = vld [vmem:[#allocation4 + $0x8] sm:$0xff]   ;;  %v241_v52 = vlaneseq }
  0x7e   :  { %918 = vmatprep.subr.bf16.mxu0 %v1237_v0  ;;  %926 = vmatprep.mubr.msk.bf16.mxu0 %vm1238_vm0, %v1237_v0  ;;  %v986_v3 = vld [vmem:[#allocation4 + $0x10] sm:$0xff]   ;;  %v987_v4 = vld [vmem:[#allocation4 + $0x18] sm:$0xff]   ;;  %vm171_vm1 = vcmask 523264   ;;  %v988_v7 = vld [vmem:[#allocation6 + $0x4] ss:$8 sps:$4 sm:$0xff]   ;;  %v1239_v23 = vmov 0  }
  0x7f   :  { %919 = vmatpush3.bf16.msra.mxu0 %v984_v1  ;;  %v130_v5 = vld [vmem:[#allocation2] sm:$0xff]  ;;  %v990_v8 = vld [vmem:[#allocation6] ss:$8 sps:$4 sm:$0xff]   ;;  %331 = vmatprep.subr.bf16.mxu1 %v988_v7  ;;  %v994_v11 = vld [vmem:[#allocation6 + $0x24] ss:$8 sps:$4 sm:$0xff]   ;;  %v242_v53 = vshrl.u32 %v241_v52, 7 }
  0x80   :  { %920 = vmatprep.subr.bf16.mxu0 %v1237_v0  ;;  %v131_v6 = vpack.c.bf16 %v130_v5, %v130_v5  ;;  %332 = vmatpush1.bf16.msra.mxu1 %v990_v8  ;;  %v991_v9 = vld [vmem:[#allocation6 + $0x14] ss:$8 sps:$4 sm:$0xff]   ;;  %v993_v10 = vld [vmem:[#allocation6 + $0x10] ss:$8 sps:$4 sm:$0xff]   ;;  %v996_v12 = vld [vmem:[#allocation6 + $0x20] ss:$8 sps:$4 sm:$0xff]  }
  0x81   :  { %333 = vmatprep.subr.bf16.mxu1 %v991_v9  ;;  %v997_v13 = vld [vmem:[#allocation6 + $0x34] ss:$8 sps:$4 sm:$0xff]   ;;  %v999_v14 = vld [vmem:[#allocation6 + $0x30] ss:$8 sps:$4 sm:$0xff]   ;;  %v1000_v15 = vld [vmem:[#allocation6 + $0x44] ss:$8 sps:$4 sm:$0xff]   ;;  %363 = vmatprep.mubr.bf16.mxu1 %v1239_v23 }
  0x82   :  { %v1002_v16 = vld [vmem:[#allocation6 + $0x40] ss:$8 sps:$4 sm:$0xff]   ;;  %v1003_v17 = vld [vmem:[#allocation6 + $0x54] ss:$8 sps:$4 sm:$0xff]   ;;  %v1005_v18 = vld [vmem:[#allocation6 + $0x50] ss:$8 sps:$4 sm:$0xff]  }
  0x83   :  { %921 = vmatpush3.bf16.msra.mxu0 %v985_v2  ;;  %v1006_v19 = vld [vmem:[#allocation6 + $0x64] ss:$8 sps:$4 sm:$0xff]   ;;  %v1008_v20 = vld [vmem:[#allocation6 + $0x60] ss:$8 sps:$4 sm:$0xff]   ;;  %v1009_v21 = vld [vmem:[#allocation6 + $0x74] ss:$8 sps:$4 sm:$0xff]  }
  0x84   :  { %922 = vmatprep.subr.bf16.mxu0 %v1237_v0  ;;  %334 = vmatpush1.bf16.msra.mxu1 %v993_v10  ;;  %v1011_v22 = vld [vmem:[#allocation6 + $0x70] ss:$8 sps:$4 sm:$0xff]   ;;  %v1012_v36 = vld [vmem:[#allocation7 + $0x40] sm:$0xff]   ;;  %v1014_v38 = vld [vmem:[#allocation7 + $0x48] sm:$0xff]   ;;  %v243_v54 = vsub.s32 0, %v242_v53  ;;  %v247_v56 = vsub.s32 1, %v242_v53 }
  0x85   :  { %335 = vmatprep.subr.bf16.mxu1 %v994_v11  ;;  %v811_v24 = vld [vmem:[%s1439_s2] ss:$0 sm:$0xff]  ;;  %v1013_v37 = vld [vmem:[#allocation7] sm:$0xff]   ;;  %v1015_v39 = vld [vmem:[#allocation7 + $0x8] sm:$0xff]  }
  0x86   :  { %v1016_v40 = vld [vmem:[#allocation7 + $0x50] sm:$0xff]   ;;  %v1018_v42 = vld [vmem:[#allocation7 + $0x58] sm:$0xff]   ;;  %v1020_v44 = vld [vmem:[#allocation7 + $0x60] sm:$0xff]  }
  0x87   :  { %923 = vmatpush3.bf16.msra.mxu0 %v986_v3  ;;  %v1017_v41 = vld [vmem:[#allocation7 + $0x10] sm:$0xff]   ;;  %v1019_v43 = vld [vmem:[#allocation7 + $0x18] sm:$0xff]   ;;  %v1021_v45 = vld [vmem:[#allocation7 + $0x20] sm:$0xff]  }
  0x88   :  { %924 = vmatprep.subr.bf16.mxu0 %v1237_v0  ;;  %336 = vmatpush1.bf16.msra.mxu1 %v996_v12  ;;  %v1022_v46 = vld [vmem:[#allocation7 + $0x68] sm:$0xff]   ;;  %v1024_v48 = vld [vmem:[#allocation7 + $0x70] sm:$0xff]   ;;  %v1026_v50 = vld [vmem:[#allocation7 + $0x78] sm:$0xff]  }
  0x89   :  { %337 = vmatprep.subr.bf16.mxu1 %v997_v13  ;;  %v1023_v47 = vld [vmem:[#allocation7 + $0x28] sm:$0xff]   ;;  %v1025_v49 = vld [vmem:[#allocation7 + $0x30] sm:$0xff]   ;;  %v1027_v51 = vld [vmem:[#allocation7 + $0x38] sm:$0xff]  }
  0x8a   :  { %v239_v55 = vld [vmem:[%s1441_s4] sm:$0x3] }
  0x8b   :  { %925 = vmatpush3.bf16.msra.mxu0 %v987_v4  ;;  %v244_v57 = vrot.slane %v239_v55, %v243_v54  ;;  %v248_v58 = vrot.slane %v239_v55, %v247_v56  ;;  %v836_v23 = vld [vmem:[%s1443_s6] ss:$0 sm:$0xff] }
  0x8c   :  { %338 = vmatpush1.bf16.msra.mxu1 %v999_v14  ;;  %878 = vmatprep.subr.bf16.mxu0 %v1012_v36  ;;  %v1028_v14 = vld [vmem:[#allocation9] sm:$0xff]   ;;  %v1037_v36 = vld [vmem:[#allocation12 + $0x8] sm:$0xff]  }
  0x8d   :  { %339 = vmatprep.subr.bf16.mxu1 %v1000_v15  ;;  %v1029_v15 = vld [vmem:[#allocation9 + $0x8] sm:$0xff]  }
  0x8e   :  { %927 = vmatmul.mubr.msk.bf16.vlgmr.msra.gmra.mrb[0].mxu0 %vm171_vm1, %v131_v6 }
  0x8f   :  { %879 = vmatpush3.bf16.msra.mxu0 %v1013_v37  ;;  %v1038_v37 = vld [vmem:[#allocation12 + $0x10] sm:$0xff]  }
  0x90   :  { %340 = vmatpush1.bf16.msra.mxu1 %v1002_v16  ;;  %880 = vmatprep.subr.bf16.mxu0 %v1014_v38  ;;  %v1030_v16 = vld [vmem:[#allocation9 + $0x10] sm:$0xff]   ;;  %v1039_v38 = vld [vmem:[#allocation12 + $0x18] sm:$0xff]  }
  0x91   :  { %341 = vmatprep.subr.bf16.mxu1 %v1003_v17  ;;  %v1031_v17 = vld [vmem:[#allocation9 + $0x18] sm:$0xff]  }
  0x93   :  { %881 = vmatpush3.bf16.msra.mxu0 %v1015_v39  ;;  %v1040_v39 = vld [vmem:[#allocation12 + $0x20] sm:$0xff]  }
  0x94   :  { %342 = vmatpush1.bf16.msra.mxu1 %v1005_v18  ;;  %882 = vmatprep.subr.bf16.mxu0 %v1016_v40  ;;  %v1032_v18 = vld [vmem:[#allocation9 + $0x20] sm:$0xff]   ;;  %v1041_v40 = vld [vmem:[#allocation12 + $0x28] sm:$0xff]  }
  0x95   :  { %343 = vmatprep.subr.bf16.mxu1 %v1006_v19  ;;  %v1033_v19 = vld [vmem:[#allocation9 + $0x28] sm:$0xff]  }
  0x97   :  { %883 = vmatpush3.bf16.msra.mxu0 %v1017_v41  ;;  %v1042_v41 = vld [vmem:[#allocation12 + $0x30] sm:$0xff]  }
  0x98   :  { %344 = vmatpush1.bf16.msra.mxu1 %v1008_v20  ;;  %884 = vmatprep.subr.bf16.mxu0 %v1018_v42  ;;  %v1034_v20 = vld [vmem:[#allocation9 + $0x30] sm:$0xff]   ;;  %v1043_v42 = vld [vmem:[#allocation12 + $0x38] sm:$0xff]  }
  0x99   :  { %345 = vmatprep.subr.bf16.mxu1 %v1009_v21  ;;  %v1035_v21 = vld [vmem:[#allocation9 + $0x38] sm:$0xff]  }
  0x9b   :  { %885 = vmatpush3.bf16.msra.mxu0 %v1019_v43  ;;  %v854_v43 = vld [vmem:[#allocation10] ss:$0 sm:$0xff] }
  0x9c   :  { %346 = vmatpush1.bf16.msra.mxu1 %v1011_v22  ;;  %886 = vmatprep.subr.bf16.mxu0 %v1020_v44 }
  0x9d   :  { %930 = vmatprep.subr.bf16.mxu1 %v1237_v0 }
  0x9f   :  { %887 = vmatpush3.bf16.msra.mxu0 %v1021_v45 }
  0xa0   :  { %888 = vmatprep.subr.bf16.mxu0 %v1022_v46 }
  0xa3   :  { %889 = vmatpush3.bf16.msra.mxu0 %v1023_v47 }
  0xa4   :  { %890 = vmatprep.subr.bf16.mxu0 %v1024_v48 }
  0xa7   :  { %891 = vmatpush3.bf16.msra.mxu0 %v1025_v49 }
  0xa8   :  { %892 = vmatprep.subr.bf16.mxu0 %v1026_v50 }
  0xab   :  { %893 = vmatpush3.bf16.msra.mxu0 %v1027_v51 }
  0xac   :  { %950 = vmatprep.subr.bf16.mxu0 %v1237_v0 }
 0x161   :  { %v209_v25 = vpop.f32.mrb[0].mxu0 }
 0x162   :  { %v210_v26 = vadd.f32 %v811_v24, %v209_v25  ;;  %v928_v27 = vpop.f32.mrb[1].mxu0 }
 0x163   :  { %v212_v28 = vpop.f32.mrb[2].mxu0 }
 0x164   :  { %v817_v29 = vmul.f32 -1.442695, %v210_v26  ;;  %v929_v30 = vpop.f32.mrb[3].mxu0 }
 0x166   :  { %1044 = vpow2.f32 %v817_v29 }
 0x170   :  { %v1045_v31 = vpop.eup %1044 }
 0x171   :  { %v218_v32 = vadd.f32 1.0, %v1045_v31 }
 0x173   :  { %1046 = vrcp.f32 %v218_v32 }
 0x17d   :  { %v1047_v33 = vpop.eup %1046 }
 0x17e   :  { %v221_v34 = vmul.f32 %v1047_v33, %v210_v26 }
 0x180   :  { %v222_v35 = vpack.c.bf16 %v221_v34, %v221_v34 }
 0x182   :  { %364 = vmatmul.mubr.bf16.vlgmr.msra.gmra.mrb[0].mxu1 %v222_v35  ;;  %v1036_v35 = vld [vmem:[#allocation12] sm:$0xff]  }
 0x183   :  { %946 = vmatprep.mubr.msk.bf16.mxu1 %vm1238_vm0, %v1237_v0  ;;  %931 = vmatpush3.bf16.msra.mxu1 %v1028_v14 }
 0x184   :  { %932 = vmatprep.subr.bf16.mxu1 %v1237_v0 }
 0x187   :  { %933 = vmatpush3.bf16.msra.mxu1 %v1029_v15 }
 0x188   :  { %934 = vmatprep.subr.bf16.mxu1 %v1237_v0 }
 0x18b   :  { %935 = vmatpush3.bf16.msra.mxu1 %v1030_v16 }
 0x18c   :  { %936 = vmatprep.subr.bf16.mxu1 %v1237_v0 }
 0x18f   :  { %937 = vmatpush3.bf16.msra.mxu1 %v1031_v17 }
 0x190   :  { %938 = vmatprep.subr.bf16.mxu1 %v1237_v0 }
 0x193   :  { %939 = vmatpush3.bf16.msra.mxu1 %v1032_v18 }
 0x194   :  { %940 = vmatprep.subr.bf16.mxu1 %v1237_v0 }
 0x197   :  { %941 = vmatpush3.bf16.msra.mxu1 %v1033_v19 }
 0x198   :  { %942 = vmatprep.subr.bf16.mxu1 %v1237_v0 }
 0x19b   :  { %943 = vmatpush3.bf16.msra.mxu1 %v1034_v20 }
 0x19c   :  { %944 = vmatprep.subr.bf16.mxu1 %v1237_v0 }
 0x19f   :  { %945 = vmatpush3.bf16.msra.mxu1 %v1035_v21 }
 0x255   :  { %v365_v59 = vpop.f32.mrb[0].mxu1 }
 0x256   :  { %v366_v60 = vadd.f32 %v365_v59, %v244_v57  ;;  %v367_v61 = vpop.f32.mrb[1].mxu1 }
 0x257   :  { %v368_v62 = vadd.f32 %v367_v61, %v248_v58  ;;  %v369_v63 = vpop.f32.mrb[2].mxu1 }
 0x258   :  { %v834_v1 = vmul.f32 -1.442695, %v366_v60  ;;  %v370_v2 = vpop.f32.mrb[3].mxu1 }
 0x259   :  { %v835_v3 = vmul.f32 -1.442695, %v368_v62 }
 0x25a   :  { %1048 = vpow2.f32 %v834_v1 }
 0x25b   :  { %1050 = vpow2.f32 %v835_v3 }
 0x264   :  { %v1049_v4 = vpop.eup %1048 }
 0x265   :  { %v1051_v5 = vpop.eup %1050  ;;  %v378_v6 = vadd.f32 1.0, %v1049_v4 }
 0x266   :  { %v379_v7 = vadd.f32 1.0, %v1051_v5 }
 0x267   :  { %1052 = vrcp.f32 %v378_v6 }
 0x268   :  { %1054 = vrcp.f32 %v379_v7 }
 0x271   :  { %v1053_v8 = vpop.eup %1052 }
 0x272   :  { %v1055_v9 = vpop.eup %1054  ;;  %v384_v10 = vmul.f32 %v1053_v8, %v366_v60 }
 0x273   :  { %v385_v11 = vmul.f32 %v1055_v9, %v368_v62 }
 0x274   :  { %v386_v13 = vpack.c.bf16 %v384_v10, %v384_v10 }
 0x275   :  { %v387_v12 = vpack.c.bf16 %v385_v11, %v385_v11 }
 0x277   :  { %555 = vmatprep.mubr.bf16.mxu0 %v387_v12 }
 0x278   :  { %556 = vmatmul.mubr.bf16.vlgmr.msra.gmra.mrb[4].mxu0 %v386_v13 }
 0x279   :  { %966 = vmatprep.mubr.msk.bf16.mxu0 %vm1238_vm0, %v1237_v0  ;;  %951 = vmatpush3.bf16.msra.mxu0 %v1036_v35 }
 0x27a   :  { %952 = vmatprep.subr.bf16.mxu0 %v1237_v0 }
 0x27d   :  { %953 = vmatpush3.bf16.msra.mxu0 %v1037_v36 }
 0x27e   :  { %954 = vmatprep.subr.bf16.mxu0 %v1237_v0 }
 0x281   :  { %955 = vmatpush3.bf16.msra.mxu0 %v1038_v37 }
 0x282   :  { %956 = vmatprep.subr.bf16.mxu0 %v1237_v0 }
 0x285   :  { %957 = vmatpush3.bf16.msra.mxu0 %v1039_v38 }
 0x286   :  { %958 = vmatprep.subr.bf16.mxu0 %v1237_v0 }
 0x289   :  { %959 = vmatpush3.bf16.msra.mxu0 %v1040_v39 }
 0x28a   :  { %960 = vmatprep.subr.bf16.mxu0 %v1237_v0 }
 0x28d   :  { %961 = vmatpush3.bf16.msra.mxu0 %v1041_v40 }
 0x28e   :  { %962 = vmatprep.subr.bf16.mxu0 %v1237_v0 }
 0x291   :  { %963 = vmatpush3.bf16.msra.mxu0 %v1042_v41 }
 0x292   :  { %964 = vmatprep.subr.bf16.mxu0 %v1237_v0  ;;  %v864_v0 = vld [vmem:[%s1447_s10] ss:$0 sm:$0xff] }
 0x295   :  { %965 = vmatpush3.bf16.msra.mxu0 %v1043_v42 }
 0x34b   :  { %v894_v22 = vpop.f32.mrb[4].mxu0 }
 0x34c   :  { %v895_v24 = vpop.f32.mrb[5].mxu0 }
 0x34d   :  { %v896_v25 = vadd.f32 %v895_v24, %v894_v22  ;;  %v897_v26 = vpop.f32.mrb[6].mxu0 }
 0x34e   :  { %v898_v27 = vpop.f32.mrb[7].mxu0 }
 0x34f   :  { %v558_v28 = vadd.f32 %v896_v25, %v836_v23 }
 0x351   :  { %v853_v29 = vmul.f32 -1.442695, %v558_v28 }
 0x353   :  { %1056 = vpow2.f32 %v853_v29 }
 0x35d   :  { %v1057_v30 = vpop.eup %1056 }
 0x35e   :  { %v566_v31 = vadd.f32 1.0, %v1057_v30 }
 0x360   :  { %1058 = vrcp.f32 %v566_v31 }
 0x36a   :  { %v1059_v32 = vpop.eup %1058 }
 0x36b   :  { %v569_v33 = vmul.f32 %v1059_v32, %v558_v28 }
 0x36d   :  { %v570_v34 = vpack.c.bf16 %v569_v33, %v569_v33 }
 0x36f   :  { %947 = vmatmul.mubr.bf16.vlgmr.msra.gmra.mrb[4].mxu1 %v570_v34 }
 0x442   :  { %v676_v44 = vpop.f32.mrb[4].mxu1 }
 0x443   :  { %v677_v45 = vadd.f32 %v854_v43, %v676_v44  ;;  %v948_v46 = vpop.f32.mrb[5].mxu1 }
 0x444   :  { %v679_v47 = vpop.f32.mrb[6].mxu1 }
 0x445   :  { %v863_v48 = vmul.f32 -1.442695, %v677_v45  ;;  %v949_v49 = vpop.f32.mrb[7].mxu1 }
 0x447   :  { %1060 = vpow2.f32 %v863_v48 }
 0x451   :  { %v1061_v50 = vpop.eup %1060 }
 0x452   :  { %v685_v51 = vadd.f32 1.0, %v1061_v50 }
 0x454   :  { %1062 = vrcp.f32 %v685_v51 }
 0x45e   :  { %v1063_v52 = vpop.eup %1062 }
 0x45f   :  { %v688_v53 = vmul.f32 %v1063_v52, %v677_v45 }
 0x461   :  { %v689_v54 = vpack.c.bf16 %v688_v53, %v688_v53 }
 0x463   :  { %967 = vmatmul.mubr.bf16.vlgmr.msra.gmra.mrb[8].mxu0 %v689_v54 }
 0x536   :  { %v795_v55 = vpop.f32.mrb[8].mxu0 }
 0x537   :  { %v796_v56 = vadd.f32 %v864_v0, %v795_v55  ;;  %v968_v57 = vpop.f32.mrb[9].mxu0 }
 0x538   :  { %v798_v58 = vpop.f32.mrb[10].mxu0 }
 0x539   :  { %v801_v59 = vpack.c.bf16 %v796_v56, %v796_v56  ;;  %v969_v60 = vpop.f32.mrb[11].mxu0 }
 0x53b   :  { %802 = vst [vmem:[%s1448_s11] sm:$0xf] %v801_v59 }
 0x53c   :  { %807 = vsyncpa [#allocation3], 1 }
 0x53d   :  { %808 = vsyncpa [#allocation5], 1 }
 0x53e   :  { %809 = vsyncpa [#allocation8], 1 }
 0x53f   :  { %810 = vsyncpa [#allocation11], 1 }

</bundles_post_ra>
